<compile_context>
chip_gen: v5e
topology: v5e:2x2
jax: 0.10.0
libtpu: 0.0.40
codegen_flags: <defaults>
</compile_context>

<pallas_src>
import math

import jax
import jax.numpy as jnp
from jax.experimental import pallas as pl
from jax.experimental.pallas import tpu as pltpu


# ----------------------------- gate (plain JAX) ------------------------------

def _compute_gate(s_emb, w1_t, w2_t):
    """Squeeze-excite gate: sigmoid(SiLU(s @ W1^T) @ W2^T), float32, (1, C)."""
    s = s_emb.astype(jnp.float32)
    h = s @ w1_t.astype(jnp.float32)          # (1, C//r)
    h = h * jax.nn.sigmoid(h)                 # SiLU
    return jax.nn.sigmoid(h @ w2_t.astype(jnp.float32))   # (1, C)


# --------------------------- streaming gating kernel -------------------------

def _scale_kernel(x_ref, g_ref, o_ref):
    # x_ref: (tm, L) in x.dtype; g_ref: (1, L) float32 -> broadcast multiply.
    # Multiply happens in float32 (gate precision preserved), single rounding
    # back to the output dtype.
    o_ref[...] = (x_ref[...] * g_ref[...]).astype(o_ref.dtype)


# ------------------------------- layout helpers ------------------------------

def _pick_lanes(total, C, max_lanes=1024):
    """Largest L = k*C (<= max_lanes) dividing `total`, preferring L % 128 == 0."""
    best_aligned = None
    best_any = C
    limit = max(max_lanes, C)
    k = 1
    while k * C <= limit:
        L = k * C
        if total % L == 0:
            best_any = L
            if L % 128 == 0:
                best_aligned = L
        k += 1
    # TODO(synk): when no 128-aligned divisor exists (C < 128 and a ragged row
    # count), split a lane-dense prefix + tiny tail instead of masked stores.
    return best_aligned if best_aligned is not None else best_any


def _pick_row_tile(rows, L, elem_bytes, tile_bytes=4 << 20, min_steps=8):
    """Row tile ~tile_bytes, multiple of 8, keeping >= min_steps grid steps."""
    tm = max(1, tile_bytes // (L * elem_bytes))
    if rows > min_steps * 8:
        tm = min(tm, pl.cdiv(rows, min_steps))
    tm = max(8, (tm // 8) * 8)
    if tm >= rows:
        tm = rows            # single block: block dim == full array dim is legal
    return tm


# --------------------------------- wrapper -----------------------------------

def attention_layer(x, s_emb, w1_t, w2_t, *, donate_x=False):
    """x: (..., C); s_emb: (1, C); w1_t: (C, C//r); w2_t: (C//r, C)."""
    orig_shape = x.shape
    C = orig_shape[-1]
    total = x.size

    # 1) SE gate (1, C), float32, computed once off the hot loop (fused by XLA).
    gate = _compute_gate(s_emb, w1_t, w2_t)

    # 2) Lane-dense (rows, L) view of x (free reshape) + matching (1, L) gate row.
    elem_bytes = jnp.dtype(x.dtype).itemsize
    L = _pick_lanes(total, C)
    rows = total // L
    tm = _pick_row_tile(rows, L, elem_bytes)
    grid_m = pl.cdiv(rows, tm)

    x_flat = x.reshape(rows, L)
    gate_row = jnp.tile(gate, (1, L // C))          # (1, L), float32

    out_flat = pl.pallas_call(
        _scale_kernel,
        out_shape=jax.ShapeDtypeStruct((rows, L), x.dtype),
        grid=(grid_m,),
        in_specs=[
            pl.BlockSpec((tm, L), lambda i: (i, 0)),
            pl.BlockSpec((1, L), lambda i: (0, 0)),
        ],
        out_specs=pl.BlockSpec((tm, L), lambda i: (i, 0)),
        compiler_params=pltpu.CompilerParams(
            dimension_semantics=("parallel",),
            vmem_limit_bytes=32 << 20,
        ),
        input_output_aliases=({0: 0} if donate_x else {}),
    )(x_flat, gate_row)

    return out_flat.reshape(orig_shape)


# -------------------------------- reference ----------------------------------

def reference(x, s_emb, w1_t, w2_t):
    h = s_emb @ w1_t
    h = h * jax.nn.sigmoid(h)
    e = jax.nn.sigmoid(h @ w2_t)
    return x * e  # broadcasts over (B, N, C)


if __name__ == "__main__":
    # Small deterministic setup: channel=32, shunkrate=4, x = (B=2, N=8, C=32)
    C, R = 32, 4
    B, N = 2, 8

    key = jax.random.PRNGKey(0)
    k_x, k_s, k_w1, k_w2 = jax.random.split(key, 4)

    x = jax.random.normal(k_x, (B, N, C), dtype=jnp.float32)
    # Embedding(1, C) weight -> the single embedded row (key is always 0)
    s_emb = jax.random.normal(k_s, (1, C), dtype=jnp.float32)
    # Linear weights (PyTorch stores (out, in)); pre-transpose to (in, out)
    w1 = jax.random.normal(k_w1, (C // R, C), dtype=jnp.float32) * 0.1   # Linear1
    w2 = jax.random.normal(k_w2, (C, C // R), dtype=jnp.float32) * 0.1   # Linear2
    w1_t = w1.T  # (C, C//R)
    w2_t = w2.T  # (C//R, C)

    fwd = jax.jit(attention_layer)
    out = fwd(x, s_emb, w1_t, w2_t)
    jax.block_until_ready(out)

    ref = reference(x, s_emb, w1_t, w2_t)
    assert out.shape == x.shape
    assert jnp.allclose(out, ref, atol=1e-5, rtol=1e-5)

    print("KERNEL_OK")
</pallas_src>

<mosaic_0001>
module attributes {stable_mosaic.version = 11 : i64} {
  func.func @_scale_kernel(%arg0: i32, %arg1: memref<1x512xf32, #tpu.memory_space<vmem>>, %arg2: memref<1x512xf32, #tpu.memory_space<vmem>>, %arg3: memref<1x512xf32, #tpu.memory_space<vmem>>) attributes {dimension_semantics = [#tpu.dimension_semantics<parallel>], iteration_bounds = array<i64: 1>, scalar_prefetch = 0 : i64, scratch_operands = 0 : i64, tpu.core_type = #tpu.core_type<tc>, window_params = [{transform_indices = @transform_0, window_bounds = array<i64: 1, 512>}, {pipeline_mode = #tpu.pipeline_mode<synchronous>, transform_indices = @transform_1, window_bounds = array<i64: 1, 512>}, {transform_indices = @transform_2, window_bounds = array<i64: 1, 512>}]} {
    %c0 = arith.constant 0 : index
    %c0_0 = arith.constant 0 : index
    %0 = vector.load %arg1[%c0, %c0_0] : memref<1x512xf32, #tpu.memory_space<vmem>>, vector<1x512xf32>
    %c0_1 = arith.constant 0 : index
    %c0_2 = arith.constant 0 : index
    %1 = vector.load %arg2[%c0_1, %c0_2] : memref<1x512xf32, #tpu.memory_space<vmem>>, vector<1x512xf32>
    %2 = arith.mulf %0, %1 : vector<1x512xf32>
    %c0_3 = arith.constant 0 : index
    %c0_4 = arith.constant 0 : index
    %3 = vector.load %arg3[%c0_3, %c0_4] : memref<1x512xf32, #tpu.memory_space<vmem>>, vector<1x512xf32>
    tpu.vector_store %arg3[%c0_3, %c0_4], %2 {strides = array<i32>} : memref<1x512xf32, #tpu.memory_space<vmem>>, vector<1x512xf32>,
    return
  }
  func.func @transform_0(%arg0: i32) -> (i32, i32) {
    %c0_i32 = arith.constant 0 : i32
    %c0_i32_0 = arith.constant 0 : i32
    return %arg0, %c0_i32 : i32, i32
  }
  func.func @transform_1(%arg0: i32) -> (i32, i32) {
    %c0_i32 = arith.constant 0 : i32
    %c0_i32_0 = arith.constant 0 : i32
    %c0_i32_1 = arith.constant 0 : i32
    return %c0_i32, %c0_i32_0 : i32, i32
  }
  func.func @transform_2(%arg0: i32) -> (i32, i32) {
    %c0_i32 = arith.constant 0 : i32
    %c0_i32_0 = arith.constant 0 : i32
    return %arg0, %c0_i32 : i32, i32
  }
}

</mosaic_0001>

<bundles_post_ra>
// kernel: attention_layer.1
= control target key start
LH: loop header
LB: loop body
LE: loop exit
PB: predicated region body
PF: predicated region fallthrough
CT: control target
= control target key end

     0   :  { %v14_v0 = vlaneseq  ;;  %s47_s0 = inlined_call_operand.vmem [shape: f32[1,512], index: 0, kind: input, shape index: {}]   ;;  %s48_s1 = inlined_call_operand.vmem [shape: f32[1,512], index: 1, kind: input, shape index: {}]   ;;  %s49_s2 = inlined_call_operand.vmem [shape: f32[1,512], index: 2, kind: output, shape index: {}]  }
   0x1   :  { %v11_v1 = vld [vmem:[%s47_s0] sm:$0xf] }
   0x2   :  { %v12_v2 = vld [vmem:[%s48_s1] sm:$0xf]  ;;  %vm16_vm0 = vcmp.lt.s32.totalorder %v14_v0, 512 }
   0x3   :  { %v13_v3 = vmul.f32 %v12_v2, %v11_v1 }
   0x5   :  { %18 = vst.msk [vmem:[%s49_s2] sm:$0xf] %vm16_vm0, %v13_v3 }

</bundles_post_ra>
